<compile_context>
chip_gen: v5e
topology: v5e:2x2
jax: 0.10.0
libtpu: 0.0.40
codegen_flags: <defaults>
</compile_context>

<pallas_src>
import functools

import jax
import jax.numpy as jnp
from jax import lax
from jax.experimental import pallas as pl
from jax.experimental.pallas import tpu as pltpu


def _round_up(x, m):
    return ((x + m - 1) // m) * m


def _dist_linear_kernel(x_ref, v_ref, s_ref, o_ref):
    # x_ref: (bm, indim)   v_ref: (bn, indim)   s_ref: (1, bn)   o_ref: (bm, bn)
    x = x_ref[...].astype(jnp.float32)

    # L2-normalize activations along the feature axis (PyTorch dim=1).
    x_norm = jnp.sqrt(jnp.sum(x * x, axis=1, keepdims=True))
    inv = pl.reciprocal(x_norm + 1e-5, approx=True)          # EUP, off the VPU
    x_n = (x * inv).astype(v_ref.dtype)                       # keep MXU inputs narrow

    # Transposed-RHS contraction: contract last dims of both operands so no
    # explicit transpose of the weight tile is materialized.
    cos = lax.dot_general(
        x_n, v_ref[...],
        dimension_numbers=(((1,), (1,)), ((), ())),
        preferred_element_type=jnp.float32,
    )                                                          # (bm, bn)

    # Hoisted weight-norm + scale_factor, applied per output column.
    o_ref[...] = (cos * s_ref[...]).astype(o_ref.dtype)


def dist_linear(x, v, g, *, block_m=256, block_n=256):
    """x: (N, indim), v: (outdim, indim), g: (outdim, 1) -> (N, outdim)."""
    n, indim = x.shape
    outdim = v.shape[0]
    scale = 2.0 if outdim <= 200 else 10.0

    # Hoisted per-output-column scale: s = scale * g / ||v||_2   (1, outdim)
    v_norm = jnp.sqrt(jnp.sum(v.astype(jnp.float32) ** 2, axis=1, keepdims=True))
    s = (scale * g.astype(jnp.float32).reshape(outdim, 1) / v_norm).reshape(1, outdim)

    # Tile sizes: shrink defaults to the (padded) problem, keep (8,128) legal.
    bm = min(block_m, _round_up(n, 8))
    bn = min(block_n, _round_up(outdim, 128))
    n_pad = _round_up(n, bm)
    out_pad = _round_up(outdim, bn)

    # Wrapper-side padding (lane-dense output; padded weight rows are zero so
    # padded score columns are exactly zero and get sliced off).
    if n_pad != n:
        x = jnp.pad(x, ((0, n_pad - n), (0, 0)))
    if out_pad != outdim:
        v = jnp.pad(v, ((0, out_pad - outdim), (0, 0)))
        s = jnp.pad(s, ((0, 0), (0, out_pad - outdim)))

    # VMEM budget: double-buffered x/v/s tiles + double-buffered output tile,
    # clamped to a value that is safe on v5e/v6e (128 MiB) and v7x (64 MiB).
    xb = jnp.dtype(x.dtype).itemsize
    vb = jnp.dtype(v.dtype).itemsize
    est = 2 * (bm * indim * xb + bn * indim * vb + bn * 4) + 2 * bm * bn * xb
    vmem_limit = int(min(max(est + (16 << 20), 32 << 20), 48 << 20))

    grid = (n_pad // bm, out_pad // bn)

    out = pl.pallas_call(
        _dist_linear_kernel,
        out_shape=jax.ShapeDtypeStruct((n_pad, out_pad), x.dtype),
        grid_spec=pltpu.PrefetchScalarGridSpec(
            num_scalar_prefetch=0,
            grid=grid,
            in_specs=[
                pl.BlockSpec((bm, indim), lambda i, j: (i, 0)),   # x tile
                pl.BlockSpec((bn, indim), lambda i, j: (j, 0)),   # weight tile
                pl.BlockSpec((1, bn), lambda i, j: (0, j)),       # column scale
            ],
            out_specs=pl.BlockSpec((bm, bn), lambda i, j: (i, j)),
        ),
        compiler_params=pltpu.CompilerParams(
            dimension_semantics=("parallel", "parallel"),
            vmem_limit_bytes=vmem_limit,
        ),
    )(x, v, s)

    return out[:n, :outdim]


def dist_linear_ref(x, v, g):
    """Pure-JAX reference mirroring the PyTorch forward."""
    outdim = v.shape[0]
    scale = 2.0 if outdim <= 200 else 10.0
    x_norm = jnp.linalg.norm(x, axis=1, keepdims=True)
    x_n = x / (x_norm + 1e-5)
    w = v * (g / jnp.linalg.norm(v, axis=1, keepdims=True))
    return scale * (x_n @ w.T)


if __name__ == "__main__":
    key = jax.random.PRNGKey(0)

    # --- Small case (outdim <= 200 -> scale_factor = 2), single-tile grid ---
    N, INDIM, OUTDIM = 16, 32, 16
    kx, kv, kx2, kv2 = jax.random.split(key, 4)

    x = jax.random.normal(kx, (N, INDIM), dtype=jnp.float32)
    # v plays the role of 'weight_v'; g ('weight_g') is initialized to the
    # per-row norm of v, exactly as WeightNorm.apply does at init time.
    v = jax.random.normal(kv, (OUTDIM, INDIM), dtype=jnp.float32) * 0.1
    g = jnp.linalg.norm(v, axis=1, keepdims=True)

    out = jax.block_until_ready(dist_linear(x, v, g))
    ref = dist_linear_ref(x, v, g)
    # approx reciprocal on the EUP perturbs scores slightly -> loosened tol.
    assert out.shape == ref.shape
    assert jnp.allclose(out, ref, atol=5e-3, rtol=5e-3), "mismatch (small case)"

    # --- Larger case exercising padding + multi-tile grid (scale_factor = 10) ---
    N2, INDIM2, OUTDIM2 = 300, 256, 384
    x2 = jax.random.normal(kx2, (N2, INDIM2), dtype=jnp.float32)
    v2 = jax.random.normal(kv2, (OUTDIM2, INDIM2), dtype=jnp.float32) * 0.1
    g2 = jnp.linalg.norm(v2, axis=1, keepdims=True)

    out2 = jax.block_until_ready(dist_linear(x2, v2, g2))
    ref2 = dist_linear_ref(x2, v2, g2)
    assert out2.shape == ref2.shape
    assert jnp.allclose(out2, ref2, atol=5e-3, rtol=5e-3), "mismatch (large case)"

    print("KERNEL_OK")
</pallas_src>

<mosaic_0001>
module attributes {stable_mosaic.version = 11 : i64} {
  func.func @_dist_linear_kernel(%arg0: i32, %arg1: i32, %arg2: memref<16x32xf32, #tpu.memory_space<vmem>>, %arg3: memref<128x32xf32, #tpu.memory_space<vmem>>, %arg4: memref<1x128xf32, #tpu.memory_space<vmem>>, %arg5: memref<16x128xf32, #tpu.memory_space<vmem>>) attributes {dimension_semantics = [#tpu.dimension_semantics<parallel>, #tpu.dimension_semantics<parallel>], iteration_bounds = array<i64: 1, 1>, scalar_prefetch = 0 : i64, scratch_operands = 0 : i64, tpu.core_type = #tpu.core_type<tc>, window_params = [{transform_indices = @transform_0, window_bounds = array<i64: 16, 32>}, {transform_indices = @transform_1, window_bounds = array<i64: 128, 32>}, {transform_indices = @transform_2, window_bounds = array<i64: 1, 128>}, {transform_indices = @transform_3, window_bounds = array<i64: 16, 128>}]} {
    %c0 = arith.constant 0 : index
    %c0_0 = arith.constant 0 : index
    %0 = vector.load %arg2[%c0, %c0_0] : memref<16x32xf32, #tpu.memory_space<vmem>>, vector<16x32xf32>
    %1 = arith.mulf %0, %0 : vector<16x32xf32>
    %cst = arith.constant dense<0.000000e+00> : vector<16xf32>
    %2 = vector.multi_reduction <add>, %1, %cst [1] : vector<16x32xf32> to vector<16xf32>
    %3 = vector.shape_cast %2 : vector<16xf32> to vector<16x1xf32>
    %4 = math.sqrt %3 : vector<16x1xf32>
    %cst_1 = arith.constant 9.99999974E-6 : f32
    %5 = vector.broadcast %cst_1 : f32 to vector<16x1xf32>
    %6 = arith.addf %4, %5 : vector<16x1xf32>
    %7 = tpu.reciprocal %6 {approx = true} : vector<16x1xf32> -> vector<16x1xf32>
    %8 = vector.broadcast %7 : vector<16x1xf32> to vector<16x32xf32>
    %9 = arith.mulf %0, %8 : vector<16x32xf32>
    %c0_2 = arith.constant 0 : index
    %c0_3 = arith.constant 0 : index
    %10 = vector.load %arg3[%c0_2, %c0_3] : memref<128x32xf32, #tpu.memory_space<vmem>>, vector<128x32xf32>
    %cst_4 = arith.constant dense<0.000000e+00> : vector<16x128xf32>
    %11 = tpu.matmul %9, %10, %cst_4 {dimension_numbers = #tpu.dot_dimension_numbers<[1], [1], [0], [0], [0, 0, 1, 0], [], []>} : vector<16x32xf32>, vector<128x32xf32>, vector<16x128xf32> -> vector<16x128xf32>
    %c0_5 = arith.constant 0 : index
    %c0_6 = arith.constant 0 : index
    %12 = vector.load %arg4[%c0_5, %c0_6] : memref<1x128xf32, #tpu.memory_space<vmem>>, vector<1x128xf32>
    %13 = vector.broadcast %12 : vector<1x128xf32> to vector<16x128xf32>
    %14 = arith.mulf %11, %13 : vector<16x128xf32>
    %c0_7 = arith.constant 0 : index
    %c0_8 = arith.constant 0 : index
    %15 = vector.load %arg5[%c0_7, %c0_8] : memref<16x128xf32, #tpu.memory_space<vmem>>, vector<16x128xf32>
    tpu.vector_store %arg5[%c0_7, %c0_8], %14 {strides = array<i32>} : memref<16x128xf32, #tpu.memory_space<vmem>>, vector<16x128xf32>,
    return
  }
  func.func @transform_0(%arg0: i32, %arg1: i32) -> (i32, i32) {
    %c0_i32 = arith.constant 0 : i32
    %c0_i32_0 = arith.constant 0 : i32
    return %arg0, %c0_i32 : i32, i32
  }
  func.func @transform_1(%arg0: i32, %arg1: i32) -> (i32, i32) {
    %c0_i32 = arith.constant 0 : i32
    %c0_i32_0 = arith.constant 0 : i32
    return %arg1, %c0_i32 : i32, i32
  }
  func.func @transform_2(%arg0: i32, %arg1: i32) -> (i32, i32) {
    %c0_i32 = arith.constant 0 : i32
    %c0_i32_0 = arith.constant 0 : i32
    return %c0_i32, %arg1 : i32, i32
  }
  func.func @transform_3(%arg0: i32, %arg1: i32) -> (i32, i32) {
    %c0_i32 = arith.constant 0 : i32
    return %arg0, %arg1 : i32, i32
  }
}

</mosaic_0001>

<bundles_post_ra>
// kernel: tpu_custom_call.1
= control target key start
LH: loop header
LB: loop body
LE: loop exit
PB: predicated region body
PF: predicated region fallthrough
CT: control target
= control target key end

     0   :  { %vm19_vm0 = vcmask 261120   ;;  %s376_s0 = inlined_call_operand.vmem [shape: f32[16,32], index: 0, kind: input, shape index: {}]   ;;  %s377_s1 = inlined_call_operand.vmem [shape: f32[128,32], index: 1, kind: input, shape index: {}]   ;;  %s378_s2 = inlined_call_operand.vmem [shape: f32[1,128], index: 2, kind: input, shape index: {}]   ;;  %s379_s3 = inlined_call_operand.hbm [shape: f32[16,128], index: 3, kind: output, shape index: {}]  }
   0x1   :  { %v273_v0 = vld [vmem:[%s376_s0] sm:$0xff]  ;;  %v71_v1 = vld [vmem:[%s377_s1 + $0x78] sm:$0xff]  ;;  %v285_v3 = vld [vmem:[%s376_s0 + $0x8] sm:$0xff] }
   0x2   :  { %v17_v2 = vmul.f32 %v273_v0, %v273_v0  ;;  %175 = vmatpush.xpose.msk.msra.mxu0 %vm19_vm0, %v71_v1  ;;  %193 = vmatpush.xpose.msk.msra.mxu1 %vm19_vm0, %v71_v1  ;;  %v70_v4 = vld [vmem:[%s377_s1 + $0x70] sm:$0xff] }
   0x4   :  { %v20_v5 = vsel %vm19_vm0, %v17_v2, 0.0 }
   0x5   :  { %21 = vadd.xlane.f32.xlu0 %v20_v5 }
   0x6   :  { %8 = vsyncpa [#allocation3], 0  ;;  %v18_v6 = vmul.f32 %v285_v3, %v285_v3  ;;  %176 = vmatpush.xpose.msk.msra.mxu0 %vm19_vm0, %v70_v4  ;;  %194 = vmatpush.xpose.msk.msra.mxu1 %vm19_vm0, %v70_v4  ;;  %v69_v7 = vld [vmem:[%s377_s1 + $0x68] sm:$0xff]  ;;  %v68_v9 = vld [vmem:[%s377_s1 + $0x60] sm:$0xff]  ;;  %s247_s21 = smov [#allocation2]   ;;  %s163_s24 = sshll.u32 %s379_s3, 4  ;;  %s164_s24 = int_to_ptr.hbm [resolvable:$true] %s163_s24 }
   0x7   :  { %v67_v10 = vld [vmem:[%s377_s1 + $0x58] sm:$0xff]  ;;  %v66_v11 = vld [vmem:[%s377_s1 + $0x50] sm:$0xff]  ;;  %v65_v12 = vld [vmem:[%s377_s1 + $0x48] sm:$0xff]  ;;  %s161_s0 = sshll.u32 %s247_s21, 4  ;;  %s248_s25 = smov 128   ;;  %s162_s0 = int_to_ptr.vmem [resolvable:$true] %s161_s0 }
   0x8   :  { %v23_v8 = vsel %vm19_vm0, %v18_v6, 0.0  ;;  %v64_v13 = vld [vmem:[%s377_s1 + $0x40] sm:$0xff]  ;;  %v63_v14 = vld [vmem:[%s377_s1 + $0x38] sm:$0xff]  ;;  %v62_v15 = vld [vmem:[%s377_s1 + $0x30] sm:$0xff]  ;;  %s249_s26 = smov 8  }
   0x9   :  { %v61_v16 = vld [vmem:[%s377_s1 + $0x28] sm:$0xff]  ;;  %v60_v17 = vld [vmem:[%s377_s1 + $0x20] sm:$0xff]  ;;  %v59_v18 = vld [vmem:[%s377_s1 + $0x18] sm:$0xff] }
   0xa   :  { %177 = vmatpush.xpose.msk.msra.mxu0 %vm19_vm0, %v69_v7  ;;  %195 = vmatpush.xpose.msk.msra.mxu1 %vm19_vm0, %v69_v7  ;;  %v58_v19 = vld [vmem:[%s377_s1 + $0x10] sm:$0xff]  ;;  %v57_v20 = vld [vmem:[%s377_s1 + $0x8] sm:$0xff]  ;;  %v56_v21 = vld [vmem:[%s377_s1] sm:$0xff] }
   0xb   :  { %v212_v50 = vld [vmem:[%s378_s2] ss:$0 sm:$0xff] }
   0xd   :  { %24 = vadd.xlane.f32.xlu0 %v23_v8 }
   0xe   :  { %178 = vmatpush.xpose.msk.msra.mxu0 %vm19_vm0, %v68_v9  ;;  %196 = vmatpush.xpose.msk.msra.mxu1 %vm19_vm0, %v68_v9 }
  0x12   :  { %179 = vmatpush.xpose.msk.msra.mxu0 %vm19_vm0, %v67_v10  ;;  %197 = vmatpush.xpose.msk.msra.mxu1 %vm19_vm0, %v67_v10 }
  0x16   :  { %180 = vmatpush.xpose.msk.msra.mxu0 %vm19_vm0, %v66_v11  ;;  %198 = vmatpush.xpose.msk.msra.mxu1 %vm19_vm0, %v66_v11 }
  0x1a   :  { %181 = vmatpush.xpose.msk.msra.mxu0 %vm19_vm0, %v65_v12  ;;  %199 = vmatpush.xpose.msk.msra.mxu1 %vm19_vm0, %v65_v12 }
  0x1e   :  { %182 = vmatpush.xpose.msk.msra.mxu0 %vm19_vm0, %v64_v13  ;;  %200 = vmatpush.xpose.msk.msra.mxu1 %vm19_vm0, %v64_v13 }
  0x22   :  { %183 = vmatpush.xpose.msk.msra.mxu0 %vm19_vm0, %v63_v14  ;;  %201 = vmatpush.xpose.msk.msra.mxu1 %vm19_vm0, %v63_v14 }
  0x26   :  { %184 = vmatpush.xpose.msk.msra.mxu0 %vm19_vm0, %v62_v15  ;;  %202 = vmatpush.xpose.msk.msra.mxu1 %vm19_vm0, %v62_v15 }
  0x2a   :  { %185 = vmatpush.xpose.msk.msra.mxu0 %vm19_vm0, %v61_v16  ;;  %203 = vmatpush.xpose.msk.msra.mxu1 %vm19_vm0, %v61_v16 }
  0x2e   :  { %186 = vmatpush.xpose.msk.msra.mxu0 %vm19_vm0, %v60_v17  ;;  %204 = vmatpush.xpose.msk.msra.mxu1 %vm19_vm0, %v60_v17 }
  0x32   :  { %187 = vmatpush.xpose.msk.msra.mxu0 %vm19_vm0, %v59_v18  ;;  %205 = vmatpush.xpose.msk.msra.mxu1 %vm19_vm0, %v59_v18 }
  0x36   :  { %188 = vmatpush.xpose.msk.msra.mxu0 %vm19_vm0, %v58_v19  ;;  %206 = vmatpush.xpose.msk.msra.mxu1 %vm19_vm0, %v58_v19 }
  0x3a   :  { %189 = vmatpush.xpose.msk.msra.mxu0 %vm19_vm0, %v57_v20  ;;  %207 = vmatpush.xpose.msk.msra.mxu1 %vm19_vm0, %v57_v20 }
  0x3e   :  { %190 = vmatpush.xpose.msk.msra.mxu0 %vm19_vm0, %v56_v21  ;;  %208 = vmatpush.xpose.msk.msra.mxu1 %vm19_vm0, %v56_v21 }
  0x78   :  { %v22_v22 = vpop.xlane.xlu0 %21 }
  0x79   :  { %213 = vrsqrt.f32 %v22_v22  ;;  %vm33_vm1 = vcmp.eq.f32.partialorder %v22_v22, inf  ;;  %v36_v34 = vand.u32 2147483648, %v22_v22  ;;  %vm35_vm2 = vcmp.eq.f32.partialorder %v22_v22, 0.0 }
  0x7f   :  { %v214_v23 = vpop.eup %213 }
  0x80   :  { %v27_v24 = vmul.f32 %v214_v23, %v22_v22  ;;  %v25_v25 = vpop.xlane.xlu0 %24 }
  0x81   :  { %215 = vrsqrt.f32 %v25_v25  ;;  %vm45_vm3 = vcmp.eq.f32.partialorder %v25_v25, inf  ;;  %v48_v42 = vand.u32 2147483648, %v25_v25  ;;  %vm47_vm4 = vcmp.eq.f32.partialorder %v25_v25, 0.0 }
  0x82   :  { %v28_v26 = vmul.f32 %v214_v23, %v27_v24 }
  0x84   :  { %v29_v27 = vmul.f32 0.5, %v28_v26 }
  0x86   :  { %v30_v28 = vsub.f32 1.5, %v29_v27 }
  0x87   :  { %v216_v29 = vpop.eup %215 }
  0x88   :  { %v31_v30 = vmul.f32 %v214_v23, %v30_v28  ;;  %v39_v31 = vmul.f32 %v216_v29, %v25_v25 }
  0x8a   :  { %v32_v32 = vmul.f32 %v31_v30, %v22_v22  ;;  %v40_v33 = vmul.f32 %v216_v29, %v39_v31 }
  0x8c   :  { %v41_v35 = vmul.f32 0.5, %v40_v33  ;;  %v34_v36 = vsel %vm33_vm1, %v22_v22, %v32_v32 }
  0x8d   :  { %v37_v37 = vsel %vm35_vm2, %v36_v34, %v34_v36 }
  0x8e   :  { %v42_v38 = vsub.f32 1.5, %v41_v35  ;;  %v50_v39 = vadd.f32 1e-05, %v37_v37 }
  0x90   :  { %v43_v40 = vmul.f32 %v216_v29, %v42_v38  ;;  %217 = vrcp.f32 %v50_v39 }
  0x92   :  { %v44_v41 = vmul.f32 %v43_v40, %v25_v25 }
  0x94   :  { %v46_v43 = vsel %vm45_vm3, %v25_v25, %v44_v41 }
  0x95   :  { %v49_v44 = vsel %vm47_vm4, %v48_v42, %v46_v43 }
  0x96   :  { %v218_v45 = vpop.eup %217  ;;  %v51_v46 = vadd.f32 1e-05, %v49_v44 }
  0x97   :  { %v54_v47 = vmul.f32 %v218_v45, %v273_v0 }
  0x98   :  { %219 = vrcp.f32 %v51_v46 }
  0x99   :  { %191 = vmatmul.msk.f32.vlgmr.msra.gmra.mxu0 %vm19_vm0, %v54_v47 }
  0x9e   :  { %v220_v48 = vpop.eup %219 }
  0x9f   :  { %v55_v49 = vmul.f32 %v220_v48, %v285_v3 }
  0xa1   :  { %192 = vmatmul.msk.f32.vlgmr.msra.gmra.mxu1 %vm19_vm0, %v55_v49 }
 0x116   :  { %v143_v51 = vpop.f32.mrf.mxu0 }
 0x117   :  { %v153_v52 = vmul.f32 %v212_v50, %v143_v51 }
 0x119   :  { %155 = vst [vmem:[#allocation2] sm:$0xff] %v153_v52 }
 0x11e   :  { %v146_v53 = vpop.f32.mrf.mxu1 }
 0x11f   :  { %v154_v54 = vmul.f32 %v212_v50, %v146_v53 }
 0x121   :  { %156 = vst [vmem:[#allocation2 + $0x8] sm:$0xff] %v154_v54 }
 0x122   :  { %169 = dma.vmem_to_hbm [thread:$0]  %s162_s0, 256, %s164_s24, [#allocation3], %s248_s25, %s248_s25, %s249_s26  }
 0x123   :  { %245 = dma.done.wait [#allocation3], 256  }
 0x124   :  { %246 = vsyncadd [#allocation3], 4294967040 }
 0x125   :  { %174 = vsyncpa [#allocation3], 1 }

</bundles_post_ra>
